<compile_context>
chip_gen: v7x
topology: tpu7x:2x2x1
jax: 0.10.0
libtpu: 0.0.40
codegen_flags: <defaults>
</compile_context>

<pallas_src>
import functools

import jax
import jax.numpy as jnp
from jax import lax
from jax.experimental import pallas as pl
from jax.experimental.pallas import tpu as pltpu


def _contrastive_kernel(temp_ref, x_ref, ynf_ref, ynb_ref,
                        rd_ref, colp_ref, mblk_ref, *, batch, masked):
    """One row block: (tq, D) rows of x against all `batch` normalized y rows."""
    tq = x_ref.shape[0]
    ncols = ynf_ref.shape[0]                       # == batch (columns of sim)

    inv_temp = jnp.float32(1.0) / temp_ref[0]
    eps2 = jnp.float32(1e-24)                      # (F.normalize eps = 1e-12)^2

    # Normalize this x row block in f32 (v5e-friendly) and fold 1/temperature in.
    x = x_ref[...].astype(jnp.float32)
    ss_x = jnp.sum(x * x, axis=1, keepdims=True)
    xn = x * (lax.rsqrt(jnp.maximum(ss_x, eps2)) * inv_temp)        # (tq, D)

    # Logits: contraction on dim 1 of both operands (no XLU transpose).  The RHS
    # was normalized + cast to the matmul dtype once, in the wrapper; only the
    # small (tq, D) LHS tile is cast per step.
    yn = ynf_ref[...]
    sim = lax.dot_general(xn.astype(yn.dtype), yn,
                          (((1,), (1,)), ((), ())),
                          preferred_element_type=jnp.float32)       # (tq, B)

    # Diagonal logits via a (tq, D) multiply-reduce in f32 (no (B, B) iota mask).
    diag = jnp.sum(xn * ynb_ref[...].astype(jnp.float32),
                   axis=1, keepdims=True)                           # (tq, 1)

    if masked:
        # Last row block may extend past `batch`; padded rows can hold garbage.
        row0 = pl.program_id(0) * tq
        rows = lax.broadcasted_iota(jnp.int32, (tq, 1), 0) + row0
        valid = rows < batch
        sim = jnp.where(valid, sim, jnp.float32(-1e30))

    # Single exp sweep with a per-row max shift -> exact per-row logsumexp for
    # any temperature value (no fixed analytic shift).
    m_r = jnp.max(sim, axis=1, keepdims=True)                       # (tq, 1)
    e = jnp.exp(sim - m_r)                                          # (tq, B), <= 1
    row_lse = jnp.log(jnp.sum(e, axis=1, keepdims=True)) + m_r      # (tq, 1)

    # Per-block column exp-sum partials, rescaled to one per-block shift so the
    # wrapper can combine blocks as a logsumexp-of-partials.  Invalid (masked)
    # rows get w == 0 automatically (m_r == -1e30).
    m_b = jnp.max(m_r, keepdims=True)                               # (1, 1)
    w = jnp.exp(m_r - m_b)                                          # (tq, 1)
    colp = jnp.sum(e * w, axis=0, keepdims=True)                    # (1, B)

    # loss = 0.5/B * (sum_r lse_row + sum_c lse_col - 2*sum_r diag); fold the
    # "- 2*diag" into the per-block row partial.
    rd = row_lse - 2.0 * diag                                       # (tq, 1)
    if masked:
        rd = jnp.where(valid, rd, 0.0)

    rd_ref[...] = jnp.reshape(jnp.sum(rd), (1, 1, 1))
    colp_ref[...] = jnp.reshape(colp, (1, 1, ncols))
    mblk_ref[...] = jnp.reshape(m_b, (1, 1, 1))


def _pick_block_rows(batch, target):
    """Row-tile height: the full batch if small, else `target` (multiple of 8).

    Non-divisible batches are handled with an in-kernel validity mask, so we
    never degrade to tiny odd tiles just to divide `batch` exactly.
    """
    target = max(8, (int(target) // 8) * 8)
    if batch <= target:
        return batch
    return target


def _vmem_budget_bytes(frac=0.80):
    """Generation-aware VMEM budget (~80% of per-core capacity)."""
    cap = 64 * 1024 * 1024          # conservative fallback (v7x per-TC VMEM)
    try:
        info = pltpu.get_tpu_info()
        cap = int(getattr(info, "vmem_capacity_bytes", cap) or cap)
    except Exception:
        pass
    return int(frac * cap)


def contrastive_loss_with_learnable_temp(embedding_x, embedding_y, temperature,
                                         *, block_rows=256, bf16_matmul=True):
    """Forward of ContrastiveLossWithLearnableTemp (symmetric InfoNCE)."""
    B, D = embedding_x.shape
    assert embedding_y.shape == (B, D), (embedding_x.shape, embedding_y.shape)

    tq = _pick_block_rows(B, block_rows)
    n_blocks = pl.cdiv(B, tq)
    masked = (B % tq) != 0

    # ---- wrapper-side prep (cheap fused XLA; keeps the kernel prologue-free) ---
    mm_dtype = jnp.bfloat16 if bf16_matmul else jnp.float32
    y32 = embedding_y.astype(jnp.float32)
    yn = (y32 * lax.rsqrt(jnp.maximum(jnp.sum(y32 * y32, axis=1, keepdims=True),
                                      1e-24))).astype(mm_dtype)
    temp = jnp.reshape(jnp.asarray(temperature, jnp.float32), (1,))

    # ---- generation-aware VMEM budget + explicit guard -------------------------
    budget = _vmem_budget_bytes()
    xb = jnp.dtype(embedding_x.dtype).itemsize
    yb = jnp.dtype(mm_dtype).itemsize
    est = (2 * tq * D * xb          # double-buffered x row tiles
           + 2 * B * D * yb         # resident normalized y (2 pipeline buffers)
           + 2 * tq * D * yb        # double-buffered diag row tiles of y
           + 4 * tq * B * 4         # sim / exp / mask temporaries (f32)
           + 4 * (B + 16) * 4)      # per-block partial outputs
    if est > budget:
        # TODO(synk): fall back to column tiling of B instead of raising.
        raise ValueError(
            f"contrastive kernel VMEM estimate {est} B exceeds budget {budget} B;"
            f" reduce block_rows (tq={tq}), enable bf16_matmul, or tile columns.")

    kernel = functools.partial(_contrastive_kernel, batch=B, masked=masked)

    rd_p, col_p, m_b = pl.pallas_call(
        kernel,
        out_shape=(
            jax.ShapeDtypeStruct((n_blocks, 1, 1), jnp.float32),   # sum(lse_row - 2*diag)
            jax.ShapeDtypeStruct((n_blocks, 1, B), jnp.float32),   # column exp-sum partials
            jax.ShapeDtypeStruct((n_blocks, 1, 1), jnp.float32),   # per-block shift
        ),
        grid=(n_blocks,),
        in_specs=[
            pl.BlockSpec(memory_space=pltpu.MemorySpace.SMEM),     # temperature (1,)
            pl.BlockSpec((tq, D), lambda i: (i, 0)),               # x row block
            pl.BlockSpec((B, D), lambda i: (0, 0)),                # yn, resident
            pl.BlockSpec((tq, D), lambda i: (i, 0)),               # yn row block (diag)
        ],
        out_specs=(
            pl.BlockSpec((1, 1, 1), lambda i: (i, 0, 0)),
            pl.BlockSpec((1, 1, B), lambda i: (i, 0, 0)),
            pl.BlockSpec((1, 1, 1), lambda i: (i, 0, 0)),
        ),
        compiler_params=pltpu.CompilerParams(
            dimension_semantics=("parallel",),   # independent row blocks -> v7x 2-TC
            vmem_limit_bytes=budget,
        ),
    )(temp, embedding_x, yn, yn)

    # ---- tiny XLA epilogue: combine per-block partials --------------------------
    rd_sum = jnp.sum(rd_p)                                         # sum(lse_row) - 2*sum(diag)
    m_b = m_b[:, 0, 0]                                             # (n_blocks,)
    g = jnp.max(m_b)
    col_es = jnp.sum(col_p[:, 0, :] * jnp.exp(m_b - g)[:, None], axis=0)   # (B,)
    sum_lse_col = jnp.sum(jnp.log(col_es)) + jnp.float32(B) * g
    return 0.5 * (rd_sum + sum_lse_col) / jnp.float32(B)


def _reference(embedding_x, embedding_y, temperature):
    """Pure-JAX reference mirroring the PyTorch forward."""
    def norm(v):
        return v / jnp.maximum(jnp.linalg.norm(v, axis=1, keepdims=True), 1e-12)
    xn, yn = norm(embedding_x), norm(embedding_y)
    sim_xy = xn @ yn.T / temperature
    sim_yx = yn @ xn.T / temperature
    labels = jnp.arange(sim_xy.shape[0])

    def ce(logits):
        lse = jax.scipy.special.logsumexp(logits, axis=1)
        return jnp.mean(lse - logits[jnp.arange(logits.shape[0]), labels])

    return 0.5 * (ce(sim_xy) + ce(sim_yx))


if __name__ == "__main__":
    key = jax.random.PRNGKey(0)
    kx, ky = jax.random.split(key)

    # Small CLIP-style embedding batch; learnable temperature init = 0.07.
    B, D = 16, 32
    embedding_x = jax.random.normal(kx, (B, D), dtype=jnp.float32)
    embedding_y = jax.random.normal(ky, (B, D), dtype=jnp.float32)
    temperature = jnp.array(0.07, dtype=jnp.float32)

    ref = _reference(embedding_x, embedding_y, temperature)

    # Default path: bf16 MXU, block_rows=8 -> 2 parallel row blocks.
    loss_bf16 = jax.block_until_ready(
        contrastive_loss_with_learnable_temp(
            embedding_x, embedding_y, temperature, block_rows=8))
    assert jnp.allclose(loss_bf16, ref, rtol=2e-2, atol=5e-2), (loss_bf16, ref)

    # f32 MXU path, tight tolerance.
    loss_f32 = jax.block_until_ready(
        contrastive_loss_with_learnable_temp(
            embedding_x, embedding_y, temperature, block_rows=8,
            bf16_matmul=False))
    assert jnp.allclose(loss_f32, ref, rtol=5e-4, atol=5e-4), (loss_f32, ref)

    # Ragged batch (B not a multiple of the row tile) exercises the mask path.
    B2 = 12
    x2 = jax.random.normal(jax.random.PRNGKey(1), (B2, D), dtype=jnp.float32)
    y2 = jax.random.normal(jax.random.PRNGKey(2), (B2, D), dtype=jnp.float32)
    ref2 = _reference(x2, y2, temperature)
    loss2 = jax.block_until_ready(
        contrastive_loss_with_learnable_temp(
            x2, y2, temperature, block_rows=8, bf16_matmul=False))
    assert jnp.allclose(loss2, ref2, rtol=5e-4, atol=5e-4), (loss2, ref2)

    print("KERNEL_OK")
</pallas_src>

<mosaic_0001>
module attributes {stable_mosaic.version = 11 : i64} {
  func.func @_contrastive_kernel(%arg0: i32, %arg1: memref<1xf32, #tpu.memory_space<smem>>, %arg2: memref<8x32xf32, #tpu.memory_space<vmem>>, %arg3: memref<16x32xbf16, #tpu.memory_space<vmem>>, %arg4: memref<8x32xbf16, #tpu.memory_space<vmem>>, %arg5: memref<1x1x1xf32, #tpu.memory_space<vmem>>, %arg6: memref<1x1x16xf32, #tpu.memory_space<vmem>>, %arg7: memref<1x1x1xf32, #tpu.memory_space<vmem>>) attributes {dimension_semantics = [#tpu.dimension_semantics<parallel>], iteration_bounds = array<i64: 2>, scalar_prefetch = 0 : i64, scratch_operands = 0 : i64, tpu.core_type = #tpu.core_type<tc>, window_params = [{transform_indices = @transform_0, window_bounds = array<i64: 1>}, {transform_indices = @transform_1, window_bounds = array<i64: 8, 32>}, {pipeline_mode = #tpu.pipeline_mode<synchronous>, transform_indices = @transform_2, window_bounds = array<i64: 16, 32>}, {transform_indices = @transform_3, window_bounds = array<i64: 8, 32>}, {transform_indices = @transform_4, window_bounds = array<i64: 1, 1, 1>}, {transform_indices = @transform_5, window_bounds = array<i64: 1, 1, 16>}, {transform_indices = @transform_6, window_bounds = array<i64: 1, 1, 1>}]} {
    %c0 = arith.constant 0 : index
    %0 = memref.load %arg1[%c0] : memref<1xf32, #tpu.memory_space<smem>>
    %cst = arith.constant 1.000000e+00 : f32
    %1 = arith.divf %cst, %0 : f32
    %c0_0 = arith.constant 0 : index
    %c0_1 = arith.constant 0 : index
    %2 = vector.load %arg2[%c0_0, %c0_1] : memref<8x32xf32, #tpu.memory_space<vmem>>, vector<8x32xf32>
    %3 = arith.mulf %2, %2 : vector<8x32xf32>
    %cst_2 = arith.constant dense<0.000000e+00> : vector<8xf32>
    %4 = vector.multi_reduction <add>, %3, %cst_2 [1] : vector<8x32xf32> to vector<8xf32>
    %5 = vector.shape_cast %4 : vector<8xf32> to vector<8x1xf32>
    %cst_3 = arith.constant 1.000000e-24 : f32
    %6 = vector.broadcast %cst_3 : f32 to vector<8x1xf32>
    %7 = arith.maximumf %5, %6 : vector<8x1xf32>
    %8 = math.rsqrt %7 : vector<8x1xf32>
    %9 = vector.broadcast %1 : f32 to vector<8x1xf32>
    %10 = arith.mulf %8, %9 : vector<8x1xf32>
    %11 = vector.broadcast %10 : vector<8x1xf32> to vector<8x32xf32>
    %12 = arith.mulf %2, %11 : vector<8x32xf32>
    %c0_4 = arith.constant 0 : index
    %c0_5 = arith.constant 0 : index
    %13 = vector.load %arg3[%c0_4, %c0_5] : memref<16x32xbf16, #tpu.memory_space<vmem>>, vector<16x32xbf16>
    %14 = arith.truncf %12 : vector<8x32xf32> to vector<8x32xbf16>
    %cst_6 = arith.constant dense<0.000000e+00> : vector<8x16xf32>
    %15 = tpu.matmul %14, %13, %cst_6 {dimension_numbers = #tpu.dot_dimension_numbers<[1], [1], [0], [0], [0, 0, 1, 0], [], []>} : vector<8x32xbf16>, vector<16x32xbf16>, vector<8x16xf32> -> vector<8x16xf32>
    %c0_7 = arith.constant 0 : index
    %c0_8 = arith.constant 0 : index
    %16 = vector.load %arg4[%c0_7, %c0_8] : memref<8x32xbf16, #tpu.memory_space<vmem>>, vector<8x32xbf16>
    %17 = arith.extf %16 : vector<8x32xbf16> to vector<8x32xf32>
    %18 = arith.mulf %12, %17 : vector<8x32xf32>
    %cst_9 = arith.constant dense<0.000000e+00> : vector<8xf32>
    %19 = vector.multi_reduction <add>, %18, %cst_9 [1] : vector<8x32xf32> to vector<8xf32>
    %20 = vector.shape_cast %19 : vector<8xf32> to vector<8x1xf32>
    %cst_10 = arith.constant dense<0xFF800000> : vector<8xf32>
    %21 = vector.multi_reduction <maximumf>, %15, %cst_10 [1] : vector<8x16xf32> to vector<8xf32>
    %22 = vector.shape_cast %21 : vector<8xf32> to vector<8x1xf32>
    %23 = vector.broadcast %22 : vector<8x1xf32> to vector<8x16xf32>
    %24 = arith.subf %15, %23 : vector<8x16xf32>
    %25 = math.exp %24 : vector<8x16xf32>
    %cst_11 = arith.constant dense<0.000000e+00> : vector<8xf32>
    %26 = vector.multi_reduction <add>, %25, %cst_11 [1] : vector<8x16xf32> to vector<8xf32>
    %27 = vector.shape_cast %26 : vector<8xf32> to vector<8x1xf32>
    %28 = math.log %27 : vector<8x1xf32>
    %29 = arith.addf %28, %22 : vector<8x1xf32>
    %30 = vector.shape_cast %22 : vector<8x1xf32> to vector<1x8x1xf32>
    %cst_12 = arith.constant dense<0xFF800000> : vector<1xf32>
    %31 = vector.multi_reduction <maximumf>, %30, %cst_12 [1, 2] : vector<1x8x1xf32> to vector<1xf32>
    %32 = vector.shape_cast %31 : vector<1xf32> to vector<1x1x1xf32>
    %33 = vector.extract %32[0, 0, 0] : f32 from vector<1x1x1xf32>
    %34 = vector.broadcast %33 : f32 to vector<1x1xf32>
    %35 = vector.broadcast %34 : vector<1x1xf32> to vector<8x1xf32>
    %36 = arith.subf %22, %35 : vector<8x1xf32>
    %37 = math.exp %36 : vector<8x1xf32>
    %38 = vector.broadcast %37 : vector<8x1xf32> to vector<8x16xf32>
    %39 = arith.mulf %25, %38 : vector<8x16xf32>
    %cst_13 = arith.constant dense<0.000000e+00> : vector<16xf32>
    %40 = vector.multi_reduction <add>, %39, %cst_13 [0] : vector<8x16xf32> to vector<16xf32>
    %41 = vector.shape_cast %40 : vector<16xf32> to vector<1x16xf32>
    %cst_14 = arith.constant 2.000000e+00 : f32
    %42 = vector.broadcast %cst_14 : f32 to vector<8x1xf32>
    %43 = arith.mulf %42, %20 : vector<8x1xf32>
    %44 = arith.subf %29, %43 : vector<8x1xf32>
    %45 = vector.shape_cast %44 : vector<8x1xf32> to vector<1x8x1xf32>
    %cst_15 = arith.constant dense<0.000000e+00> : vector<1xf32>
    %46 = vector.multi_reduction <add>, %45, %cst_15 [1, 2] : vector<1x8x1xf32> to vector<1xf32>
    %47 = vector.shape_cast %46 : vector<1xf32> to vector<1x1x1xf32>
    %48 = vector.extract %47[0, 0, 0] : f32 from vector<1x1x1xf32>
    %49 = vector.broadcast %48 : f32 to vector<1x1x1xf32>
    %c0_16 = arith.constant 0 : index
    %c0_17 = arith.constant 0 : index
    %c0_18 = arith.constant 0 : index
    %50 = vector.load %arg5[%c0_16, %c0_17, %c0_18] : memref<1x1x1xf32, #tpu.memory_space<vmem>>, vector<1x1x1xf32>
    tpu.vector_store %arg5[%c0_16, %c0_17, %c0_18], %49 {strides = array<i32>} : memref<1x1x1xf32, #tpu.memory_space<vmem>>, vector<1x1x1xf32>,
    %51 = vector.shape_cast %41 : vector<1x16xf32> to vector<1x1x16xf32>
    %c0_19 = arith.constant 0 : index
    %c0_20 = arith.constant 0 : index
    %c0_21 = arith.constant 0 : index
    %52 = vector.load %arg6[%c0_19, %c0_20, %c0_21] : memref<1x1x16xf32, #tpu.memory_space<vmem>>, vector<1x1x16xf32>
    tpu.vector_store %arg6[%c0_19, %c0_20, %c0_21], %51 {strides = array<i32>} : memref<1x1x16xf32, #tpu.memory_space<vmem>>, vector<1x1x16xf32>,
    %53 = vector.shape_cast %34 : vector<1x1xf32> to vector<1x1x1xf32>
    %c0_22 = arith.constant 0 : index
    %c0_23 = arith.constant 0 : index
    %c0_24 = arith.constant 0 : index
    %54 = vector.load %arg7[%c0_22, %c0_23, %c0_24] : memref<1x1x1xf32, #tpu.memory_space<vmem>>, vector<1x1x1xf32>
    tpu.vector_store %arg7[%c0_22, %c0_23, %c0_24], %53 {strides = array<i32>} : memref<1x1x1xf32, #tpu.memory_space<vmem>>, vector<1x1x1xf32>,
    return
  }
  func.func @transform_0(%arg0: i32) -> i32 {
    %c0_i32 = arith.constant 0 : i32
    %c0_i32_0 = arith.constant 0 : i32
    return %c0_i32 : i32
  }
  func.func @transform_1(%arg0: i32) -> (i32, i32) {
    %c0_i32 = arith.constant 0 : i32
    %c0_i32_0 = arith.constant 0 : i32
    return %arg0, %c0_i32 : i32, i32
  }
  func.func @transform_2(%arg0: i32) -> (i32, i32) {
    %c0_i32 = arith.constant 0 : i32
    %c0_i32_0 = arith.constant 0 : i32
    %c0_i32_1 = arith.constant 0 : i32
    return %c0_i32, %c0_i32_0 : i32, i32
  }
  func.func @transform_3(%arg0: i32) -> (i32, i32) {
    %c0_i32 = arith.constant 0 : i32
    %c0_i32_0 = arith.constant 0 : i32
    return %arg0, %c0_i32 : i32, i32
  }
  func.func @transform_4(%arg0: i32) -> (i32, i32, i32) {
    %c0_i32 = arith.constant 0 : i32
    %c0_i32_0 = arith.constant 0 : i32
    %c0_i32_1 = arith.constant 0 : i32
    return %arg0, %c0_i32, %c0_i32_0 : i32, i32, i32
  }
  func.func @transform_5(%arg0: i32) -> (i32, i32, i32) {
    %c0_i32 = arith.constant 0 : i32
    %c0_i32_0 = arith.constant 0 : i32
    %c0_i32_1 = arith.constant 0 : i32
    return %arg0, %c0_i32, %c0_i32_0 : i32, i32, i32
  }
  func.func @transform_6(%arg0: i32) -> (i32, i32, i32) {
    %c0_i32 = arith.constant 0 : i32
    %c0_i32_0 = arith.constant 0 : i32
    %c0_i32_1 = arith.constant 0 : i32
    return %arg0, %c0_i32, %c0_i32_0 : i32, i32, i32
  }
}

</mosaic_0001>

<bundles_post_ra>
// kernel: tpu_custom_call.1
= control target key start
LH: loop header
LB: loop body
LE: loop exit
PB: predicated region body
PF: predicated region fallthrough
CT: control target
= control target key end

     0   :  { %s1086_s0 = inlined_call_operand.<no memory space> [shape: f32[1], index: 0, kind: input, shape index: {}]   ;;  %s1087_s1 = inlined_call_operand.hbm [shape: f32[16,32], index: 1, kind: input, shape index: {}]   ;;  %s1088_s2 = inlined_call_operand.hbm [shape: bf16[16,32], index: 2, kind: input, shape index: {}]   ;;  %s1089_s3 = inlined_call_operand.vmem [shape: bf16[16,32], index: 3, kind: input, shape index: {}]   ;;  %s1090_s4 = inlined_call_operand.vmem [shape: f32[2,1,1], index: 4, kind: output, shape index: {0}]   ;;  %s1091_s5 = inlined_call_operand.hbm [shape: f32[2,1,16], index: 5, kind: output, shape index: {1}]   ;;  %s1092_s6 = inlined_call_operand.vmem [shape: f32[2,1,1], index: 6, kind: output, shape index: {2}]  }
   0x1   :  { %12 = sst [smem:[#allocation2]] %s1086_s0 }
   0x2   :  { %13 = vsyncpa [#allocation4], 0 }
   0x3   :  { %15 = vsyncpa [#allocation4 + $0x1], 0 }
   0x4   :  { %16 = vsyncpa [#allocation7], 0 }
   0x5   :  { %17 = vsyncpa [#allocation5], 0 }
   0x6   :  { %19 = vsyncpa [#allocation5 + $0x1], 0  ;;  %s870_s23 = smov 0   ;;  %s872_s24 = smov 0  }
   0x7   :  { %s874_s25 = smov 0   ;;  %s876_s26 = smov 0  }
   0x8 LB: > { %s891_s0 = sadd.s32 4294967295, %s823_s26   ;;  %s594_s27 = sadd.s32 4294967294, %s823_s26   ;;  %s823_s26 = sphi %s876_s26, %s1112_s26   ;;  %s819_s25 = sphi %s874_s25, %s1111_s25   ;;  %s815_s24 = sphi %s872_s24, %s1110_s24   ;;  %s811_s23 = sphi %s870_s23, %s1109_s23  }
   0x9   : > { %p66_p0 = scmp.ne.s32.totalorder %s815_s24, %s811_s23  ;;  %p1093_p1 = scmp.eq.s32.totalorder %s891_s0, 0 }
   0xa   : > { %p169_p3 = scmp.eq.s32.totalorder %s594_s27, 1  ;;  %p595_p5 = scmp.ge.s32.totalorder %s823_s26, 1 }
   0xb   : > { %p900_p4 = por %p1093_p1, %p66_p0  ;;  %p202_p7 = scmp.lt.s32.totalorder %s823_s26, 3 }
   0xc   : > { %p905_p6 = por %p169_p3, %p66_p0  ;;  %s825_s7 = smov [#allocation6]  }
   0xd   : > { %s1096_s28 = scalar_select %p900_p4, 1, 0 }
   0xe   : > { %s1097_s29 = scalar_select %p905_p6, 1, 0 }
   0xf   : > { %p910_p8 = pnand %p595_p5, %p202_p7  ;;  %s217_s8 = sshll.u32 %s825_s7, 4  ;;  %s914_s8 = int_to_ptr.vmem [resolvable:$true] %s217_s8 }
  0x10   : > { %s926_s10 = sadd.s32 1, %s823_s26   ;;  %s53_s11 = sadd.s32 1, %s819_s25 }
  0x11   : > { %s1098_s30 = scalar_select %p910_p8, 1, 0 }
  0x12   : > { %p631_p9 = pneg %p910_p8  ;;  %s50_s12 = ssub.s32 %s823_s26, %s926_s10 }
  0x13   : > { %s695_s15 = scalar_lea.hbm %s1088_s2, 128 }
  0x14   : > { %p921_p11 = pnand %p631_p9, %p1093_p1  ;;  %p696_p12 = scmp.ne.s32.totalorder %s1088_s2, %s695_s15 }
  0x15   : > { %p702_p5 = scmp.lt.u32.totalorder %s695_s15, %s1088_s2 }
  0x16   : > { %p697_p13 = pneg %p921_p11 }
  0x18   : > { %p698_p0 = pnand %p697_p13, %p696_p12 }
  0x1a   : > { %p699_p3 = pneg %p698_p0 }
  0x1c   : > { %p704_p7 = pnand %p702_p5, %p699_p3 }
  0x1e   : > { %707 = shalt.err (!%p704_p7)
}
  0x1f   : > { %s708_s20 = scalar_lea.vmem %s914_s8, 128  ;;  %p716_p2 = scmp.lt.s32.totalorder %s914_s8, %s914_s8 }
  0x20   : > { %p709_p9 = scmp.ne.s32.totalorder %s914_s8, %s708_s20  ;;  %p717_p6 = scmp.lt.s32.totalorder %s708_s20, %s708_s20 }
  0x22   : > { %p711_p10 = pnand %p709_p9, %p697_p13  ;;  %p718_p4 = por %p717_p6, %p716_p2 }
  0x24   : > { %p712_p1 = pneg %p711_p10 }
  0x26   : > { %p719_p8 = pnand %p718_p4, %p712_p1 }
  0x28   : > { %722 = shalt.err (!%p719_p8)
}
  0x29   : > { %s826_s21 = smov 64   ;;  %s827_s22 = smov 4  }
  0x2a   : > { %634 = dma.hbm_to_vmem [thread:$0]  (!%p921_p11), %s1088_s2, 128, %s914_s8, [#allocation7], %s826_s21, %s826_s21, %s827_s22  }
  0x2b   : > { %p51_p2 = scmp.eq.s32.totalorder %s50_s12, 0  ;;  %p60_p1 = scmp.ne.s32.totalorder %s819_s25, %s815_s24 }
  0x2c   : > { %p61_p4 = scmp.eq.s32.totalorder %s823_s26, 0  ;;  %p644_p6 = scmp.lt.s32.totalorder %s823_s26, 2 }
  0x2d   : > { %s957_s13 = scalar_select %p51_p2, %s819_s25, %s53_s11  }
  0x2e   : > { %p62_p8 = por %p61_p4, %p60_p1  ;;  %p1100_p10 = scmp.eq.s32.totalorder %s891_s0, 1 }
  0x2f   : > { %s231_s15 = sand.u32 1, %s819_s25   ;;  %s599_s16 = sshll.u32 %s823_s26, 7 }
  0x30   : > { %p961_p12 = por %p1100_p10, %p60_p1  ;;  %s598_s17 = sshll.u32 %s231_s15, 3 }
  0x31   : > { %s970_s19 = scalar_lea.hbm %s1087_s1, %s599_s16  ;;  %s235_s8 = scalar_lea.vmem [#allocation3], %s598_s17 }
  0x32   : > { %s242_s11 = sshll.u32 %s235_s8, 4  ;;  %p972_p11 = pnand %p644_p6, %p62_p8  ;;  %s976_s11 = int_to_ptr.vmem [resolvable:$true] %s242_s11 }
  0x33   : > { %s232_s20 = scalar_lea.sflag [#allocation4], %s231_s15  ;;  %s723_s21 = scalar_lea.hbm %s970_s19, 128 }
  0x34   : > { %p724_p13 = scmp.ne.s32.totalorder %s970_s19, %s723_s21  ;;  %p725_p0 = pneg %p972_p11 }
  0x35   : > { %s728_s7 = scalar_lea.hbm %s1087_s1, 256  ;;  %p729_p7 = scmp.lt.u32.totalorder %s970_s19, %s1087_s1 }
  0x36   : > { %p726_p3 = pnand %p725_p0, %p724_p13  ;;  %p730_p9 = scmp.lt.u32.totalorder %s728_s7, %s723_s21 }
  0x37   : > { %p732_p1 = scmp.lt.u32.totalorder %s723_s21, %s970_s19 }
  0x38   : > { %p727_p5 = pneg %p726_p3  ;;  %p731_p2 = por %p730_p9, %p729_p7 }
  0x3a   : > { %p733_p4 = por %p732_p1, %p731_p2 }
  0x3c   : > { %p734_p6 = pnand %p733_p4, %p727_p5 }
  0x3e   : > { %737 = shalt.err (!%p734_p6)
}
  0x3f   : > { %s738_s15 = scalar_lea.vmem %s976_s11, 128  ;;  %s828_s9 = smov [#allocation3]  }
  0x40   : > { %p739_p8 = scmp.ne.s32.totalorder %s976_s11, %s738_s15  ;;  %s743_s18 = sshll.u32 %s828_s9, 4  ;;  %s744_s18 = int_to_ptr.vmem [resolvable:$false] %s743_s18 }
  0x41   : > { %s745_s8 = scalar_lea.vmem %s744_s18, 256  ;;  %p746_p3 = scmp.lt.s32.totalorder %s976_s11, %s744_s18 }
  0x42   : > { %p741_p10 = pnand %p739_p8, %p725_p0  ;;  %p747_p7 = scmp.lt.s32.totalorder %s745_s8, %s738_s15 }
  0x44   : > { %p742_p13 = pneg %p741_p10  ;;  %p748_p9 = por %p747_p7, %p746_p3 }
  0x46   : > { %p749_p2 = pnand %p748_p9, %p742_p13 }
  0x48   : > { %752 = shalt.err (!%p749_p2)
}
  0x49   : > { %638 = dma.hbm_to_vmem [thread:$0]  (!%p972_p11), %s970_s19, 128, %s976_s11, %s232_s20  }
  0x4a   : > { %p1103_p5 = scmp.ne.s32.totalorder %s1098_s30, 0 }
  0x4b   : > { %s1006_s21 = sand.u32 (!%p1103_p5), 1, %s815_s24   ;;  %p1104_p0 = scmp.ne.s32.totalorder (!%p1103_p5), %s1096_s28, 0 }
  0x4c   : > { %258 = sbr.rel (%p1103_p5) target bundleno = 989 (0x3dd), region = 36  ;;  %s601_s22 = sshll.u32 (!%p1103_p5), %s1006_s21, 3 }
  0x4d   : > { %s261_s27 = scalar_lea.sflag (!%p1103_p5), [#allocation4], %s1006_s21  ;;  %s264_s7 = scalar_lea.vmem (!%p1103_p5), [#allocation3], %s601_s22 }
  0x53   : > { %798 = dma.done.wait (%p1104_p0), %s261_s27, 128  }
  0x54   : > { %800 = vsyncadd (%p1104_p0), %s261_s27, 4294967168  ;;  %p1105_p1 = scmp.eq.s32.totalorder %s891_s0, 0 }
  0x56   : > { %802 = dma.done.wait (%p1105_p1), [#allocation7], 128   ;;  %p1106_p11 = pmov %p1105_p1 }
  0x57   : > { %s317_s30 = sld [smem:[#allocation2]]  ;;  %v321_v0 = vld [vmem:[%s264_s7] sm:$0xff]  ;;  %vm323_vm0 = vcmask 261120   ;;  %v684_v5 = vld [vmem:[#allocation6] sm:$0xff]   ;;  %v829_v6 = vmov 0.0   ;;  %vm830_vm1 = vmmov 0  }
  0x58   : > { %804 = vsyncadd (%p1106_p11), [#allocation7], 4294967168  ;;  %v322_v2 = vmul.f32 %v321_v0, %v321_v0  ;;  %611 = vmatprep.subr.bf16.mxu0 %v829_v6  ;;  %v344_v7 = vsel %vm323_vm0, %v684_v5, 0  ;;  %613 = vmatprep.mubr.msk.bf16.mxu0 %vm830_vm1, %v829_v6  ;;  %vm392_vm2 = vcmask 130048   ;;  %p306_p4 = scmp.lt.s32.totalorder %s891_s0, 1  ;;  %vm438_vm3 = vcmask 0  }
  0x59   : > { %612 = vmatpush3.bf16.xpose.msra.mxu0 %v344_v7  ;;  %vm440_vm4 = vcmask 122880   ;;  %s300_s8 = scalar_lea.vmem [#allocation8], %s1006_s21  ;;  %vm426_vm5 = vcmask 7168   ;;  %s606_s22 = sshll.u32 %s891_s0, 4 }
  0x5a   : > { %v324_v3 = vsel %vm323_vm0, %v322_v2, 0.0  ;;  %s1024_s19 = scalar_select %p306_p4, %s891_s0, 1 }
  0x5b   : > { %325 = vadd.xlane.f32.xlu0 %v324_v3  ;;  %s465_s27 = sshll.u32 %s300_s8, 4  ;;  %s831_s20 = smov [#allocation8]   ;;  %s466_s27 = int_to_ptr.vmem [resolvable:$true] %s465_s27 }
  0x5c   : > { %s603_s11 = sshll.u32 %s1024_s19, 2  ;;  %s315_s9 = scalar_lea.vmem %s1092_s6, %s1024_s19 }
  0x5d   : > { %v318_v1 = vstv %s317_s30  ;;  %s309_s16 = scalar_lea.vmem %s1089_s3, %s603_s11  ;;  %s447_s11 = scalar_lea.sflag [#allocation5], %s1006_s21 }
  0x5e   : > { %685 = vrcp.f32 %v318_v1  ;;  %v386_v28 = vld [vmem:[%s309_s16] sm:$0xf]  ;;  %s753_s12 = scalar_lea.vmem %s466_s27, 16  ;;  %s757_s16 = sshll.u32 %s831_s20, 4  ;;  %s758_s16 = int_to_ptr.vmem [resolvable:$false] %s757_s16 }
  0x5f   : > { %v387_v30 = vunpack.c.l.bf16 %v386_v28  ;;  %p754_p6 = scmp.ne.s32.totalorder %s466_s27, %s753_s12  ;;  %s759_s17 = scalar_lea.vmem %s758_s16, 32 }
  0x60   : > { %p760_p13 = scmp.lt.s32.totalorder %s466_s27, %s758_s16  ;;  %p761_p3 = scmp.lt.s32.totalorder %s759_s17, %s753_s12 }
  0x61   : > { %p755_p8 = pnand %p754_p6, %p961_p12 }
  0x62   : > { %p762_p7 = por %p761_p3, %p760_p13 }
  0x63   : > { %p756_p10 = pneg %p755_p8 }
  0x65   : > { %p763_p9 = pnand %p762_p7, %p756_p10 }
  0x68   : > { %v686_v4 = vpop.eup %685 }
  0x69   : > { %617 = vpush %v686_v4 }
  0x9a   : > { %s618_s28 = spop %617 }
  0x9b   : > { %v329_v10 = vstv %s618_s28  ;;  %s1043_s28 = scalar_lea.hbm %s1091_s5, %s606_s22 }
  0xe8   : > { %v326_v8 = vpop.xlane.xlu0 %325 }
  0xe9   : > { %v327_v9 = vmax.f32 %v326_v8, 1e-24 }
  0xeb   : > { %687 = vrsqrt.f32 %v327_v9 }
  0xf5   : > { %v688_v11 = vpop.eup %687 }
  0xf6   : > { %v330_v12 = vmul.f32 %v688_v11, %v329_v10 }
  0xf8   : > { %v331_v13 = vmul.f32 %v330_v12, %v321_v0 }
  0xfa   : > { %v334_v14 = vpack.c.bf16 %v331_v13, %v331_v13  ;;  %v388_v33 = vmul.f32 %v387_v30, %v331_v13 }
  0xfc   : > { %614 = vmatmul.mubr.msk.bf16.vlgmr.msra.gmra.mrb[0].mxu0 %vm323_vm0, %v334_v14  ;;  %v389_v34 = vsel %vm323_vm0, %v388_v33, 0.0 }
 0x1cf   : > { %v380_v15 = vpop.f32.mrb[0].mxu0 }
 0x1d0   : > { %v615_v16 = vpop.f32.mrb[1].mxu0  ;;  %v393_v17 = vsel %vm392_vm2, %v380_v15, -inf }
 0x1d1   : > { %394 = vmax.xlane.f32.xlu0 %v393_v17  ;;  %v383_v18 = vpop.f32.mrb[2].mxu0 }
 0x1d2   : > { %v616_v19 = vpop.f32.mrb[3].mxu0 }
 0x25e   : > { %v395_v20 = vpop.xlane.xlu0 %394 }
 0x25f   : > { %v396_v21 = vsub.f32 %v380_v15, %v395_v20  ;;  %v405_v22 = vrot.slane %v395_v20, 4 }
 0x261   : > { %v397_v23 = vmul.f32 1.442695, %v396_v21  ;;  %v406_v24 = vmax.f32 %v395_v20, %v405_v22 }
 0x263   : > { %689 = vpow2.f32 %v397_v23  ;;  %v407_v25 = vrot.slane %v406_v24, 2 }
 0x265   : > { %v408_v26 = vmax.f32 %v406_v24, %v407_v25 }
 0x267   : > { %v409_v27 = vrot.slane %v408_v26, 1 }
 0x269   : > { %v410_v29 = vmax.f32 %v408_v26, %v409_v27 }
 0x26b   : > { %619 = vpush %v410_v29 }
 0x26d   : > { %v690_v31 = vpop.eup %689 }
 0x26e   : > { %v399_v32 = vsel %vm392_vm2, %v690_v31, 0.0 }
 0x26f   : > { %400 = vadd.xlane.f32.xlu1 %v399_v32 }
 0x273   : > { %390 = vadd.xlane.f32.xlu1 %v389_v34 }
 0x29c   : > { %s620_s18 = spop %619 }
 0x29d   : > { %v412_v35 = vstv %s620_s18 }
 0x29e   : > { %v413_v36 = vsub.f32 %v395_v20, %v412_v35  ;;  %442 = vst.msk [vmem:[%s315_s9] sm:$0x1] %vm438_vm3, %v412_v35 }
 0x2a0   : > { %v414_v37 = vmul.f32 1.442695, %v413_v36 }
 0x2a2   : > { %691 = vpow2.f32 %v414_v37 }
 0x2ac   : > { %v692_v38 = vpop.eup %691 }
 0x2ad   : > { %v416_v39 = vmul.f32 %v692_v38, %v690_v31 }
 0x2af   : > { %v417_v40 = vsel %vm392_vm2, %v416_v39, 0.0 }
 0x2b0   : > { %v418_v41 = vrot.slane %v417_v40, 4 }
 0x2b2   : > { %v419_v42 = vadd.f32 %v418_v41, %v417_v40 }
 0x2b4   : > { %v420_v43 = vrot.slane %v419_v42, 2 }
 0x2b6   : > { %v421_v44 = vadd.f32 %v420_v43, %v419_v42 }
 0x2b8   : > { %v422_v45 = vrot.slane %v421_v44, 1 }
 0x2ba   : > { %v423_v46 = vadd.f32 %v422_v45, %v421_v44 }
 0x2bc   : > { %441 = vst.msk [vmem:[%s300_s8] sm:$0x1] %vm440_vm4, %v423_v46 }
 0x2fc   : > { %v401_v47 = vpop.xlane.xlu1 %400 }
 0x2fd   : > { %693 = vlog2.f32 %v401_v47 }
 0x300   : > { %v391_v49 = vpop.xlane.xlu1 %390 }
 0x301   : > { %v424_v52 = vmul.f32 2.0, %v391_v49 }
 0x307   : > { %v694_v48 = vpop.eup %693 }
 0x308   : > { %v403_v50 = vmul.f32 0.6931472, %v694_v48 }
 0x30a   : > { %v404_v51 = vadd.f32 %v403_v50, %v395_v20 }
 0x30c   : > { %v425_v53 = vsub.f32 %v404_v51, %v424_v52 }
 0x30e   : > { %v427_v54 = vsel %vm426_vm5, %v425_v53, 0.0 }
 0x30f   : > { %428 = vadd.xlane.f32.xlu0 %v427_v54 }
 0x310   : > { %766 = shalt.err (!%p763_p9)
}
 0x311   : > { %s767_s0 = scalar_lea.hbm %s1043_s28, 16  ;;  %s771_s9 = scalar_lea.hbm %s1091_s5, 32 }
 0x312   : > { %p768_p2 = scmp.ne.s32.totalorder %s1043_s28, %s767_s0  ;;  %p772_p1 = scmp.lt.u32.totalorder %s1043_s28, %s1091_s5 }
 0x313   : > { %p773_p11 = scmp.lt.u32.totalorder %s771_s9, %s767_s0  ;;  %p775_p6 = scmp.lt.u32.totalorder %s767_s0, %s1043_s28 }
 0x314   : > { %p769_p5 = pnand %p768_p2, %p961_p12 }
 0x315   : > { %p774_p4 = por %p773_p11, %p772_p1 }
 0x316   : > { %p770_p0 = pneg %p769_p5 }
 0x317   : > { %p776_p8 = por %p775_p6, %p774_p4 }
 0x319   : > { %p777_p10 = pnand %p776_p8, %p770_p0 }
 0x31b   : > { %780 = shalt.err (!%p777_p10)
}
 0x31c   : > { %629 = dma.vmem_to_hbm [thread:$0]  (%p961_p12), %s466_s27, 16, %s1043_s28, %s447_s11  }
 0x31d   : > { %s312_s30 = scalar_lea.vmem %s1090_s4, %s1024_s19 }
 0x39c   : > { %v429_v55 = vpop.xlane.xlu0 %428 }
 0x39d   : > { %v430_v56 = vrot.slane %v429_v55, 4 }
 0x39f   : > { %v431_v57 = vadd.f32 %v430_v56, %v429_v55 }
 0x3a1   : > { %v432_v58 = vrot.slane %v431_v57, 2 }
 0x3a3   : > { %v433_v59 = vadd.f32 %v432_v58, %v431_v57 }
 0x3a5   : > { %v434_v60 = vrot.slane %v433_v59, 1 }
 0x3a7   : > { %v435_v61 = vadd.f32 %v434_v60, %v433_v59 }
 0x3a9   : > { %621 = vpush %v435_v61 }
 0x3da   : > { %s622_s12 = spop %621 }
 0x3db   : > { %v437_v62 = vstv %s622_s12 }
 0x3dc   : > { %439 = vst.msk [vmem:[%s312_s30] sm:$0x1] %vm438_vm3, %v437_v62 }
 0x3dd PF: > { %s486_s14 = sand.u32 1, %s811_s23   ;;  %p1107_p12 = scmp.ne.s32.totalorder %s1097_s29, 0 }
 0x3de   : > { %p1108_p13 = scmp.ge.s32.totalorder %s823_s26, 2  ;;  %s487_s27 = scalar_lea.sflag [#allocation5], %s486_s14 }
 0x3e0   : > { %p640_p3 = pnand %p1108_p13, %p1107_p12 }
 0x3e2   : > { %806 = dma.done.wait (!%p640_p3), %s487_s27, 16  }
 0x3e3   : > { %808 = vsyncadd (!%p640_p3), %s487_s27, 4294967280  ;;  %p22_p7 = scmp.ge.s32.totalorder %s926_s10, 4   ;;  %s1109_s23 = smov %s815_s24 }
 0x3e4   : > { %s1110_s24 = smov %s819_s25  ;;  %s1111_s25 = smov %s957_s13 }
 0x3e5   : > { %s1112_s26 = smov %s926_s10  ;;  %24 = sbr.rel (!%p22_p7) target bundleno = 8 (0x8), region = 112 }
 0x3ec   :  { %497 = vsyncpa [#allocation4], 1 }
 0x3ed   :  { %499 = vsyncpa [#allocation4 + $0x1], 1 }
 0x3ee   :  { %500 = vsyncpa [#allocation7], 1 }
 0x3ef   :  { %501 = vsyncpa [#allocation5], 1 }
 0x3f0   :  { %503 = vsyncpa [#allocation5 + $0x1], 1 }

</bundles_post_ra>
